<compile_context>
chip_gen: v7x
topology: tpu7x:2x2x1
jax: 0.10.0
libtpu: 0.0.40
codegen_flags: <defaults>
</compile_context>

<pallas_src>
import math

import jax
import jax.numpy as jnp
from jax.experimental import pallas as pl
from jax.experimental.pallas import tpu as pltpu


def _se_kernel(x_ref, w1s_ref, w2_ref, o_ref):
    # x_ref  : (Bb, C, HW)  activations
    # w1s_ref: (Cr, C)      Linear(C -> Cr) weight, pre-scaled by 1/(H*W)
    # w2_ref : (C, Cr)      Linear(Cr -> C) weight
    # Global average pool: the 1/(H*W) factor is folded into w1s, so a plain
    # sum over the spatial lane axis suffices.
    pooled = jnp.sum(x_ref[...], axis=2)                         # (Bb, C)

    # FC1 + ReLU: contract over C directly against w1s (Cr, C) -- no transpose.
    hidden = jnp.maximum(
        jnp.einsum("bc,rc->br", pooled, w1s_ref[...],
                   preferred_element_type=jnp.float32),
        0.0,
    )                                                            # (Bb, Cr)

    # FC2 + Sigmoid: contract over Cr directly against w2 (C, Cr).
    scale = jax.nn.sigmoid(
        jnp.einsum("br,cr->bc", hidden, w2_ref[...],
                   preferred_element_type=jnp.float32)
    )                                                            # (Bb, C)

    # Re-index x_ref here (re-load from VMEM is ~free; avoids holding the
    # whole block live across the serial FC/sigmoid chain) and broadcast the
    # per-(batch, channel) scale along the lane (spatial) axis.
    o_ref[...] = (x_ref[...] * scale[:, :, None]).astype(o_ref.dtype)


def _choose_bb(B, block_bytes_per_b, target_block_bytes, min_steps):
    """Largest divisor bb of B such that bb*block_bytes <= target and the grid
    has >= min_steps steps; prefers an even step count (v7x: 2 TensorCores)."""
    bb_cap = max(1, target_block_bytes // max(1, block_bytes_per_b))
    if B >= min_steps:
        bb_cap = min(bb_cap, max(1, B // min_steps))
    bb_cap = max(1, min(bb_cap, B))
    divisors = [d for d in range(1, bb_cap + 1) if B % d == 0]
    best = divisors[-1]
    even = [d for d in divisors if (B // d) % 2 == 0]
    if even:
        best = even[-1]
    return best


def se_block_forward(x_nchw, w1, w2):
    """x_nchw: (B, C, H, W); w1: (C//r, C); w2: (C, C//r). Returns (B, C, H, W)."""
    B, C, H, W = x_nchw.shape
    HW = H * W
    Cr = w1.shape[0]
    itemsize = jnp.dtype(x_nchw.dtype).itemsize
    w_itemsize = jnp.dtype(w1.dtype).itemsize

    # Contiguous (free) view -- no pad, no slice-back.
    x3 = x_nchw.reshape(B, C, HW)

    # Fold the average-pool divisor into the tiny first FC weight.
    w1s = w1 * (1.0 / HW)

    # Generation-aware VMEM ceiling (v7x: 64 MiB per TensorCore).
    try:
        vmem_cap = pltpu.get_tpu_info().vmem_capacity_bytes
    except Exception:
        vmem_cap = 128 << 20
    vmem_ceiling = (40 << 20) if vmem_cap <= (64 << 20) else (56 << 20)

    # Deep grid: ~2 MiB per input/output block, >= 8 steps when B allows
    # (>= 4 per core on v7x) so double-buffering reaches the HBM roofline.
    block_bytes_per_b = C * HW * itemsize
    bb = _choose_bb(B, block_bytes_per_b,
                    target_block_bytes=2 << 20, min_steps=min(B, 8))
    grid_b = B // bb

    w_bytes = 2 * C * Cr * w_itemsize                 # both FC weights
    needed = 4 * bb * block_bytes_per_b + 2 * w_bytes + (2 << 20)
    if needed > vmem_ceiling:
        # TODO(synk): HW-tiled two-pass fallback (pool pass + scale pass) for
        # feature maps whose single (C, H*W) plane exceeds the VMEM budget.
        raise NotImplementedError(
            "se_block_forward: one (C, H*W) plane does not fit the VMEM "
            f"pipeline budget ({needed} > {vmem_ceiling} bytes)")
    vmem_bytes = int(min(max(needed, 16 << 20), vmem_ceiling))

    cost = pl.CostEstimate(
        flops=4 * B * C * Cr + 2 * B * C * HW,
        transcendentals=B * C,
        bytes_accessed=2 * B * C * HW * itemsize + 2 * w_bytes,
    )

    def build(weight_pipeline_mode):
        w_kwargs = ({} if weight_pipeline_mode is None
                    else {"pipeline_mode": weight_pipeline_mode})
        return pl.pallas_call(
            _se_kernel,
            out_shape=jax.ShapeDtypeStruct((B, C, HW), x3.dtype),
            grid_spec=pltpu.PrefetchScalarGridSpec(
                num_scalar_prefetch=0,
                grid=(grid_b,),
                in_specs=[
                    pl.BlockSpec((bb, C, HW), lambda b: (b, 0, 0)),
                    pl.BlockSpec((Cr, C), lambda b: (0, 0), **w_kwargs),
                    pl.BlockSpec((C, Cr), lambda b: (0, 0), **w_kwargs),
                ],
                out_specs=pl.BlockSpec((bb, C, HW), lambda b: (b, 0, 0)),
            ),
            compiler_params=pltpu.CompilerParams(
                dimension_semantics=("parallel",),
                vmem_limit_bytes=vmem_bytes,
            ),
            cost_estimate=cost,
        )

    # Weights have a constant index_map -> single-buffer them (saves one VMEM
    # copy per weight, which matters under the tighter v7x budget).  Fall back
    # to default double-buffering if this pipeline_mode is rejected.
    try:
        out = jax.block_until_ready(build(pl.Buffered(1))(x3, w1s, w2))
    except Exception:
        out = build(None)(x3, w1s, w2)

    return out.reshape(B, C, H, W)


def _reference(x, w1, w2):
    # Pure-JAX reference matching the PyTorch module semantics.
    y = jnp.mean(x, axis=(2, 3))                 # (B, C)
    y = jnp.maximum(y @ w1.T, 0.0)               # (B, C//r)
    y = jax.nn.sigmoid(y @ w2.T)                 # (B, C)
    return x * y[:, :, None, None]


if __name__ == "__main__":
    B, C, H, W = 2, 32, 16, 16
    reduction = 16
    Cr = C // reduction

    key = jax.random.PRNGKey(0)
    kx, k1, k2 = jax.random.split(key, 3)
    x = jax.random.normal(kx, (B, C, H, W), dtype=jnp.float32)

    # Deterministic Kaiming-uniform-like init (matches nn.Linear default bound).
    bound1 = 1.0 / math.sqrt(C)
    bound2 = 1.0 / math.sqrt(Cr)
    w1 = jax.random.uniform(k1, (Cr, C), minval=-bound1, maxval=bound1,
                            dtype=jnp.float32)   # Linear(C -> Cr) weight
    w2 = jax.random.uniform(k2, (C, Cr), minval=-bound2, maxval=bound2,
                            dtype=jnp.float32)   # Linear(Cr -> C) weight

    out = se_block_forward(x, w1, w2)
    out = jax.block_until_ready(out)

    ref = _reference(x, w1, w2)
    assert out.shape == (B, C, H, W)
    assert jnp.allclose(out, ref, atol=1e-5, rtol=1e-5), "mismatch vs reference"

    print("KERNEL_OK")
</pallas_src>

<mosaic_0001>
module attributes {stable_mosaic.version = 11 : i64} {
  func.func @_se_kernel(%arg0: i32, %arg1: memref<1x32x256xf32, #tpu.memory_space<vmem>>, %arg2: memref<2x32xf32, #tpu.memory_space<vmem>>, %arg3: memref<32x2xf32, #tpu.memory_space<vmem>>, %arg4: memref<1x32x256xf32, #tpu.memory_space<vmem>>) attributes {dimension_semantics = [#tpu.dimension_semantics<parallel>], iteration_bounds = array<i64: 2>, scalar_prefetch = 0 : i64, scratch_operands = 0 : i64, tpu.core_type = #tpu.core_type<tc>, window_params = [{transform_indices = @transform_0, window_bounds = array<i64: 1, 32, 256>}, {pipeline_mode = #tpu.pipeline_mode<synchronous>, transform_indices = @transform_1, window_bounds = array<i64: 2, 32>}, {pipeline_mode = #tpu.pipeline_mode<synchronous>, transform_indices = @transform_2, window_bounds = array<i64: 32, 2>}, {transform_indices = @transform_3, window_bounds = array<i64: 1, 32, 256>}]} {
    %c0 = arith.constant 0 : index
    %c0_0 = arith.constant 0 : index
    %c0_1 = arith.constant 0 : index
    %0 = vector.load %arg1[%c0, %c0_0, %c0_1] : memref<1x32x256xf32, #tpu.memory_space<vmem>>, vector<1x32x256xf32>
    %cst = arith.constant dense<0.000000e+00> : vector<1x32xf32>
    %1 = vector.multi_reduction <add>, %0, %cst [2] : vector<1x32x256xf32> to vector<1x32xf32>
    %c0_2 = arith.constant 0 : index
    %c0_3 = arith.constant 0 : index
    %2 = vector.load %arg2[%c0_2, %c0_3] : memref<2x32xf32, #tpu.memory_space<vmem>>, vector<2x32xf32>
    "tpu.trace_start"() <{level = 10 : i32, message = "bc,rc->br"}> : () -> ()
    %cst_4 = arith.constant dense<0.000000e+00> : vector<1x2xf32>
    %3 = tpu.matmul %1, %2, %cst_4 {dimension_numbers = #tpu.dot_dimension_numbers<[1], [1], [0], [0], [0, 0, 1, 0], [], []>} : vector<1x32xf32>, vector<2x32xf32>, vector<1x2xf32> -> vector<1x2xf32>
    "tpu.trace_stop"() : () -> ()
    %cst_5 = arith.constant 0.000000e+00 : f32
    %4 = vector.broadcast %cst_5 : f32 to vector<1x2xf32>
    %5 = arith.maximumf %3, %4 : vector<1x2xf32>
    %c0_6 = arith.constant 0 : index
    %c0_7 = arith.constant 0 : index
    %6 = vector.load %arg3[%c0_6, %c0_7] : memref<32x2xf32, #tpu.memory_space<vmem>>, vector<32x2xf32>
    "tpu.trace_start"() <{level = 10 : i32, message = "br,cr->bc"}> : () -> ()
    %cst_8 = arith.constant dense<0.000000e+00> : vector<1x32xf32>
    %7 = tpu.matmul %5, %6, %cst_8 {dimension_numbers = #tpu.dot_dimension_numbers<[1], [1], [0], [0], [0, 0, 1, 0], [], []>} : vector<1x2xf32>, vector<32x2xf32>, vector<1x32xf32> -> vector<1x32xf32>
    "tpu.trace_stop"() : () -> ()
    %8 = arith.negf %7 : vector<1x32xf32>
    %9 = math.exp %8 : vector<1x32xf32>
    %cst_9 = arith.constant 1.000000e+00 : f32
    %10 = vector.broadcast %cst_9 : f32 to vector<1x32xf32>
    %11 = arith.addf %10, %9 : vector<1x32xf32>
    %12 = arith.divf %10, %11 : vector<1x32xf32>
    %c0_10 = arith.constant 0 : index
    %c0_11 = arith.constant 0 : index
    %c0_12 = arith.constant 0 : index
    %13 = vector.load %arg1[%c0_10, %c0_11, %c0_12] : memref<1x32x256xf32, #tpu.memory_space<vmem>>, vector<1x32x256xf32>
    %14 = vector.shape_cast %12 : vector<1x32xf32> to vector<1x32x1xf32>
    %15 = vector.broadcast %14 : vector<1x32x1xf32> to vector<1x32x256xf32>
    %16 = arith.mulf %13, %15 : vector<1x32x256xf32>
    %c0_13 = arith.constant 0 : index
    %c0_14 = arith.constant 0 : index
    %c0_15 = arith.constant 0 : index
    %17 = vector.load %arg4[%c0_13, %c0_14, %c0_15] : memref<1x32x256xf32, #tpu.memory_space<vmem>>, vector<1x32x256xf32>
    tpu.vector_store %arg4[%c0_13, %c0_14, %c0_15], %16 {strides = array<i32>} : memref<1x32x256xf32, #tpu.memory_space<vmem>>, vector<1x32x256xf32>,
    return
  }
  func.func @transform_0(%arg0: i32) -> (i32, i32, i32) {
    %c0_i32 = arith.constant 0 : i32
    %c0_i32_0 = arith.constant 0 : i32
    %c0_i32_1 = arith.constant 0 : i32
    return %arg0, %c0_i32, %c0_i32_0 : i32, i32, i32
  }
  func.func @transform_1(%arg0: i32) -> (i32, i32) {
    %c0_i32 = arith.constant 0 : i32
    %c0_i32_0 = arith.constant 0 : i32
    %c0_i32_1 = arith.constant 0 : i32
    return %c0_i32, %c0_i32_0 : i32, i32
  }
  func.func @transform_2(%arg0: i32) -> (i32, i32) {
    %c0_i32 = arith.constant 0 : i32
    %c0_i32_0 = arith.constant 0 : i32
    %c0_i32_1 = arith.constant 0 : i32
    return %c0_i32, %c0_i32_0 : i32, i32
  }
  func.func @transform_3(%arg0: i32) -> (i32, i32, i32) {
    %c0_i32 = arith.constant 0 : i32
    %c0_i32_0 = arith.constant 0 : i32
    %c0_i32_1 = arith.constant 0 : i32
    return %arg0, %c0_i32, %c0_i32_0 : i32, i32, i32
  }
}

module attributes {stable_mosaic.version = 11 : i64} {
  func.func @_se_kernel(%arg0: i32, %arg1: memref<1x32x256xf32, #tpu.memory_space<vmem>>, %arg2: memref<2x32xf32, #tpu.memory_space<vmem>>, %arg3: memref<32x2xf32, #tpu.memory_space<vmem>>, %arg4: memref<1x32x256xf32, #tpu.memory_space<vmem>>) attributes {dimension_semantics = [#tpu.dimension_semantics<parallel>], iteration_bounds = array<i64: 2>, scalar_prefetch = 0 : i64, scratch_operands = 0 : i64, tpu.core_type = #tpu.core_type<tc>, window_params = [{transform_indices = @transform_0, window_bounds = array<i64: 1, 32, 256>}, {pipeline_mode = #tpu.pipeline_mode<synchronous>, transform_indices = @transform_1, window_bounds = array<i64: 2, 32>}, {pipeline_mode = #tpu.pipeline_mode<synchronous>, transform_indices = @transform_2, window_bounds = array<i64: 32, 2>}, {transform_indices = @transform_3, window_bounds = array<i64: 1, 32, 256>}]} {
    %c0 = arith.constant 0 : index
    %c0_0 = arith.constant 0 : index
    %c0_1 = arith.constant 0 : index
    %0 = vector.load %arg1[%c0, %c0_0, %c0_1] : memref<1x32x256xf32, #tpu.memory_space<vmem>>, vector<1x32x256xf32>
    %cst = arith.constant dense<0.000000e+00> : vector<1x32xf32>
    %1 = vector.multi_reduction <add>, %0, %cst [2] : vector<1x32x256xf32> to vector<1x32xf32>
    %c0_2 = arith.constant 0 : index
    %c0_3 = arith.constant 0 : index
    %2 = vector.load %arg2[%c0_2, %c0_3] : memref<2x32xf32, #tpu.memory_space<vmem>>, vector<2x32xf32>
    "tpu.trace_start"() <{level = 10 : i32, message = "bc,rc->br"}> : () -> ()
    %cst_4 = arith.constant dense<0.000000e+00> : vector<1x2xf32>
    %3 = tpu.matmul %1, %2, %cst_4 {dimension_numbers = #tpu.dot_dimension_numbers<[1], [1], [0], [0], [0, 0, 1, 0], [], []>} : vector<1x32xf32>, vector<2x32xf32>, vector<1x2xf32> -> vector<1x2xf32>
    "tpu.trace_stop"() : () -> ()
    %cst_5 = arith.constant 0.000000e+00 : f32
    %4 = vector.broadcast %cst_5 : f32 to vector<1x2xf32>
    %5 = arith.maximumf %3, %4 : vector<1x2xf32>
    %c0_6 = arith.constant 0 : index
    %c0_7 = arith.constant 0 : index
    %6 = vector.load %arg3[%c0_6, %c0_7] : memref<32x2xf32, #tpu.memory_space<vmem>>, vector<32x2xf32>
    "tpu.trace_start"() <{level = 10 : i32, message = "br,cr->bc"}> : () -> ()
    %cst_8 = arith.constant dense<0.000000e+00> : vector<1x32xf32>
    %7 = tpu.matmul %5, %6, %cst_8 {dimension_numbers = #tpu.dot_dimension_numbers<[1], [1], [0], [0], [0, 0, 1, 0], [], []>} : vector<1x2xf32>, vector<32x2xf32>, vector<1x32xf32> -> vector<1x32xf32>
    "tpu.trace_stop"() : () -> ()
    %8 = arith.negf %7 : vector<1x32xf32>
    %9 = math.exp %8 : vector<1x32xf32>
    %cst_9 = arith.constant 1.000000e+00 : f32
    %10 = vector.broadcast %cst_9 : f32 to vector<1x32xf32>
    %11 = arith.addf %10, %9 : vector<1x32xf32>
    %12 = arith.divf %10, %11 : vector<1x32xf32>
    %c0_10 = arith.constant 0 : index
    %c0_11 = arith.constant 0 : index
    %c0_12 = arith.constant 0 : index
    %13 = vector.load %arg1[%c0_10, %c0_11, %c0_12] : memref<1x32x256xf32, #tpu.memory_space<vmem>>, vector<1x32x256xf32>
    %14 = vector.shape_cast %12 : vector<1x32xf32> to vector<1x32x1xf32>
    %15 = vector.broadcast %14 : vector<1x32x1xf32> to vector<1x32x256xf32>
    %16 = arith.mulf %13, %15 : vector<1x32x256xf32>
    %c0_13 = arith.constant 0 : index
    %c0_14 = arith.constant 0 : index
    %c0_15 = arith.constant 0 : index
    %17 = vector.load %arg4[%c0_13, %c0_14, %c0_15] : memref<1x32x256xf32, #tpu.memory_space<vmem>>, vector<1x32x256xf32>
    tpu.vector_store %arg4[%c0_13, %c0_14, %c0_15], %16 {strides = array<i32>} : memref<1x32x256xf32, #tpu.memory_space<vmem>>, vector<1x32x256xf32>,
    return
  }
  func.func @transform_0(%arg0: i32) -> (i32, i32, i32) {
    %c0_i32 = arith.constant 0 : i32
    %c0_i32_0 = arith.constant 0 : i32
    %c0_i32_1 = arith.constant 0 : i32
    return %arg0, %c0_i32, %c0_i32_0 : i32, i32, i32
  }
  func.func @transform_1(%arg0: i32) -> (i32, i32) {
    %c0_i32 = arith.constant 0 : i32
    %c0_i32_0 = arith.constant 0 : i32
    %c0_i32_1 = arith.constant 0 : i32
    return %c0_i32, %c0_i32_0 : i32, i32
  }
  func.func @transform_2(%arg0: i32) -> (i32, i32) {
    %c0_i32 = arith.constant 0 : i32
    %c0_i32_0 = arith.constant 0 : i32
    %c0_i32_1 = arith.constant 0 : i32
    return %c0_i32, %c0_i32_0 : i32, i32
  }
  func.func @transform_3(%arg0: i32) -> (i32, i32, i32) {
    %c0_i32 = arith.constant 0 : i32
    %c0_i32_0 = arith.constant 0 : i32
    %c0_i32_1 = arith.constant 0 : i32
    return %arg0, %c0_i32, %c0_i32_0 : i32, i32, i32
  }
}

</mosaic_0001>

<bundles_post_ra>
// kernel: tpu_custom_call.1
= control target key start
LH: loop header
LB: loop body
LE: loop exit
PB: predicated region body
PF: predicated region fallthrough
CT: control target
= control target key end

     0   :  { %8 = vsyncpa [#allocation3], 0  ;;  %s1001_s0 = inlined_call_operand.hbm [shape: f32[2,32,256], index: 0, kind: input, shape index: {}]   ;;  %s1002_s1 = inlined_call_operand.vmem [shape: f32[2,32], index: 1, kind: input, shape index: {}]   ;;  %s1003_s2 = inlined_call_operand.vmem [shape: f32[32,2], index: 2, kind: input, shape index: {}]   ;;  %s1004_s3 = inlined_call_operand.hbm [shape: f32[2,32,256], index: 3, kind: output, shape index: {}]  }
   0x1   :  { %10 = vsyncpa [#allocation3 + $0x1], 0 }
   0x2   :  { %11 = vsyncpa [#allocation4], 0 }
   0x3   :  { %13 = vsyncpa [#allocation4 + $0x1], 0  ;;  %s783_s12 = smov 0   ;;  %s785_s13 = smov 0  }
   0x4   :  { %s787_s14 = smov 0   ;;  %s789_s15 = smov 0  }
   0x5 LB: > { %s804_s16 = sadd.s32 4294967295, %s752_s15   ;;  %s544_s17 = sadd.s32 4294967294, %s752_s15   ;;  %s752_s15 = sphi %s789_s15, %s1017_s15   ;;  %s748_s14 = sphi %s787_s14, %s1016_s14   ;;  %s744_s13 = sphi %s785_s13, %s1015_s13   ;;  %s740_s12 = sphi %s783_s12, %s1014_s12  }
   0x6   : > { %s808_s18 = sadd.s32 1, %s752_s15   ;;  %s26_s19 = sadd.s32 1, %s748_s14 }
   0x7   : > { %s23_s20 = ssub.s32 %s752_s15, %s808_s18  ;;  %p33_p0 = scmp.ne.s32.totalorder %s748_s14, %s744_s13 }
   0x8   : > { %p24_p1 = scmp.eq.s32.totalorder %s23_s20, 0  ;;  %p34_p2 = scmp.eq.s32.totalorder %s752_s15, 0 }
   0x9   : > { %p39_p3 = scmp.ne.s32.totalorder %s744_s13, %s740_s12  ;;  %p40_p4 = scmp.eq.s32.totalorder %s804_s16, 0 }
   0xa   : > { %s820_s21 = scalar_select %p24_p1, %s748_s14, %s26_s19  }
   0xb   : > { %p822_p5 = por %p34_p2, %p33_p0  ;;  %p826_p6 = por %p40_p4, %p39_p3 }
   0xc   : > { %p105_p7 = scmp.eq.s32.totalorder %s804_s16, 1  ;;  %p111_p8 = scmp.eq.s32.totalorder %s544_s17, 1 }
   0xd   : > { %p611_p10 = scmp.lt.s32.totalorder %s752_s15, 2  ;;  %s137_s26 = sand.u32 1, %s748_s14  }
   0xe   : > { %p833_p11 = por %p105_p7, %p33_p0  ;;  %p837_p12 = por %p111_p8, %p39_p3 }
   0xf   : > { %s566_s27 = sshll.u32 %s752_s15, 10  ;;  %s547_s28 = sshll.u32 %s137_s26, 6 }
  0x10   : > { %s1008_s24 = scalar_select %p833_p11, 1, 0 }
  0x11   : > { %s1009_s25 = scalar_select %p837_p12, 1, 0 }
  0x12   : > { %s846_s4 = scalar_lea.hbm %s1001_s0, %s566_s27  ;;  %s141_s5 = scalar_lea.vmem [#allocation2], %s547_s28 }
  0x13   : > { %s148_s6 = sshll.u32 %s141_s5, 4  ;;  %p850_p13 = pnand %p611_p10, %p822_p5  ;;  %s854_s6 = int_to_ptr.vmem [resolvable:$true] %s148_s6 }
  0x14   : > { %s856_s8 = scalar_lea.sflag [#allocation3], %s137_s26  ;;  %s656_s9 = scalar_lea.hbm %s846_s4, 1024 }
  0x15   : > { %p657_p0 = scmp.ne.s32.totalorder %s846_s4, %s656_s9  ;;  %p658_p1 = pneg %p850_p13 }
  0x16   : > { %s661_s17 = scalar_lea.hbm %s1001_s0, 2048  ;;  %p662_p4 = scmp.lt.u32.totalorder %s846_s4, %s1001_s0 }
  0x17   : > { %p659_p2 = pnand %p658_p1, %p657_p0  ;;  %p663_p5 = scmp.lt.u32.totalorder %s661_s17, %s656_s9 }
  0x18   : > { %p665_p8 = scmp.lt.u32.totalorder %s656_s9, %s846_s4 }
  0x19   : > { %p660_p3 = pneg %p659_p2  ;;  %p664_p7 = por %p663_p5, %p662_p4 }
  0x1b   : > { %p666_p10 = por %p665_p8, %p664_p7 }
  0x1d   : > { %p667_p9 = pnand %p666_p10, %p660_p3 }
  0x1f   : > { %670 = shalt.err (!%p667_p9)
}
  0x20   : > { %s671_s22 = scalar_lea.vmem %s854_s6, 1024  ;;  %s754_s26 = smov [#allocation2]  }
  0x21   : > { %p672_p0 = scmp.ne.s32.totalorder %s854_s6, %s671_s22  ;;  %s676_s27 = sshll.u32 %s754_s26, 4  ;;  %s677_s27 = int_to_ptr.vmem [resolvable:$false] %s676_s27 }
  0x22   : > { %s678_s28 = scalar_lea.vmem %s677_s27, 2048  ;;  %p679_p11 = scmp.lt.s32.totalorder %s854_s6, %s677_s27 }
  0x23   : > { %p674_p2 = pnand %p672_p0, %p658_p1  ;;  %p680_p4 = scmp.lt.s32.totalorder %s678_s28, %s671_s22 }
  0x25   : > { %p675_p12 = pneg %p674_p2  ;;  %p681_p5 = por %p680_p4, %p679_p11 }
  0x27   : > { %p682_p7 = pnand %p681_p5, %p675_p12 }
  0x29   : > { %685 = shalt.err (!%p682_p7)
}
  0x2a   : > { %s755_s29 = smov 256   ;;  %s756_s30 = smov 16  }
  0x2b   : > { %606 = dma.hbm_to_vmem [thread:$0]  (!%p850_p13), %s846_s4, 1024, %s854_s6, %s856_s8, %s755_s29, %s755_s29, %s756_s30  }
  0x2c   : > { %p550_p9 = scmp.ge.s32.totalorder %s752_s15, 1  ;;  %p156_p1 = scmp.lt.s32.totalorder %s752_s15, 3 }
  0x2e   : > { %p157_p3 = pnand %p550_p9, %p156_p1 }
  0x2f   : > { %s887_s5 = sand.u32 (!%p157_p3), 1, %s744_s13  }
  0x30   : > { %160 = sbr.rel (%p157_p3) target bundleno = 804 (0x324), region = 32  ;;  %s551_s9 = sshll.u32 (!%p157_p3), %s887_s5, 6 }
  0x31   : > { %s163_s10 = scalar_lea.sflag (!%p157_p3), [#allocation3], %s887_s5  ;;  %s166_s11 = scalar_lea.vmem (!%p157_p3), [#allocation2], %s551_s9 }
  0x37   : > { %731 = dma.done.wait (%p826_p6), %s163_s10, 1024  }
  0x38   : > { %733 = vsyncadd (%p826_p6), %s163_s10, 4294966272  ;;  %v897_v0 = vld [vmem:[%s166_s11] sm:$0xff]  ;;  %v899_v1 = vld [vmem:[%s166_s11 + $0x8] sm:$0xff]  ;;  %v757_v12 = vmov 0.0   ;;  %vm241_vm0 = vcmask 261120   ;;  %vm758_vm1 = vmmov 0   ;;  %v214_v21 = vlaneseq }
  0x39   : > { %v901_v2 = vld [vmem:[%s166_s11 + $0x20] sm:$0xff]  ;;  %v197_v3 = vadd.f32 %v899_v1, %v897_v0  ;;  %v905_v4 = vld [vmem:[%s166_s11 + $0x28] sm:$0xff]  ;;  %v907_v5 = vld [vmem:[%s166_s11 + $0x10] sm:$0xff]  ;;  %575 = vmatprep.subr.mxu0 %v757_v12  ;;  %577 = vmatprep.mubr.msk.f32.mxu0 %vm758_vm1, %v757_v12  ;;  %vm322_vm2 = vcmask 15360   ;;  %v759_v16 = vmov 0.0|0.0   ;;  %vm225_vm4 = vcmask 130112  }
  0x3a   : > { %v909_v6 = vld [vmem:[%s166_s11 + $0x18] sm:$0xff]  ;;  %v203_v7 = vadd.f32 %v905_v4, %v901_v2  ;;  %v913_v8 = vld [vmem:[%s166_s11 + $0x30] sm:$0xff]  ;;  %v209_v13 = vld [vmem:[%s1002_s1] sm:$0x3]  ;;  %588 = vmatprep.mubr.msk.f32.mxu1 %vm758_vm1, %v757_v12  ;;  %591 = vmatprep.subr.bf16.mxu1 %v759_v16  ;;  %v215_v22 = vand.u32 127, %v214_v21  ;;  %v217_v23 = vshrl.u32 %v214_v21, 7 }
  0x3b   : > { %v915_v9 = vld [vmem:[%s166_s11 + $0x38] sm:$0xff]  ;;  %198 = vadd.xlane.f32.xlu0 %v197_v3  ;;  %v200_v10 = vadd.f32 %v909_v6, %v907_v5  ;;  %576 = vmatpush3.xpose.msk.msra.mxu0 %vm241_vm0, %v209_v13  ;;  %v318_v14 = vld [vmem:[%s1003_s2] sm:$0xff]  ;;  %v319_v15 = vld [vmem:[%s1003_s2 + $0x8] sm:$0xff]  ;;  %vm232_vm5 = vcmask 195712   ;;  %vm239_vm6 = vcmask 261312   ;;  %s188_s27 = scalar_lea.vmem [#allocation5], %s551_s9 }
  0x3c   : > { %204 = vadd.xlane.f32.xlu1 %v203_v7  ;;  %v206_v11 = vadd.f32 %v915_v9, %v913_v8  ;;  %v592_v17 = vpack.c.bf16 %v319_v15, %v318_v14  ;;  %vm593_vm3 = vmpackc.low %vm322_vm2, %vm322_vm2  ;;  %v320_v18 = vld [vmem:[%s1003_s2 + $0x10] sm:$0xff]  ;;  %v321_v19 = vld [vmem:[%s1003_s2 + $0x18] sm:$0xff]  ;;  %v220_v24 = vadd.s32 4294967288, %v215_v22  ;;  %v227_v25 = vadd.s32 4294967280, %v215_v22  ;;  %s471_s28 = sshll.u32 %s188_s27, 4  ;;  %s567_s29 = sshll.u32 %s804_s16, 10  ;;  %s950_s28 = int_to_ptr.vmem [resolvable:$true] %s471_s28 }
  0x3d   : > { %v596_v20 = vpack.c.bf16 %v321_v19, %v320_v18  ;;  %v234_v26 = vadd.s32 4294967272, %v215_v22  ;;  %v218_v28 = vsub.s32 %v215_v22, %v217_v23  ;;  %v424_v50 = vsub.s32 0, %v217_v23  ;;  %s955_s10 = scalar_lea.hbm %s1004_s3, %s567_s29  ;;  %s458_s16 = scalar_lea.sflag [#allocation4], %s887_s5 }
  0x3e   : > { %594 = vmatpush3.bf16.xpose.msk.msra.mxu1 %vm593_vm3, %v592_v17  ;;  %v223_v30 = vsub.s32 %v220_v24, %v217_v23  ;;  %v230_v31 = vsub.s32 %v227_v25, %v217_v23  ;;  %s686_s11 = scalar_lea.vmem %s950_s28, 1024  ;;  %p1011_p11 = scmp.ne.s32.totalorder %s1008_s24, 0 }
  0x3f   : > { %201 = vadd.xlane.f32.xlu0 %v200_v10  ;;  %595 = vmatprep.subr.bf16.mxu1 %v759_v16  ;;  %v237_v32 = vsub.s32 %v234_v26, %v217_v23  ;;  %p687_p6 = scmp.ne.s32.totalorder %s950_s28, %s686_s11  ;;  %s760_s23 = smov [#allocation5]  }
  0x40   : > { %207 = vadd.xlane.f32.xlu1 %v206_v11  ;;  %s690_s4 = sshll.u32 %s760_s23, 4  ;;  %s691_s4 = int_to_ptr.vmem [resolvable:$false] %s690_s4 }
  0x41   : > { %p688_p12 = pnand %p687_p6, %p1011_p11  ;;  %s692_s6 = scalar_lea.vmem %s691_s4, 2048 }
  0x42   : > { %p693_p8 = scmp.lt.s32.totalorder %s950_s28, %s691_s4  ;;  %p694_p10 = scmp.lt.s32.totalorder %s692_s6, %s686_s11 }
  0x43   : > { %p689_p13 = pneg %p688_p12 }
  0x44   : > { %p695_p0 = por %p694_p10, %p693_p8 }
  0x46   : > { %598 = vmatpush3.bf16.xpose.msk.msra.mxu1 %vm593_vm3, %v596_v20  ;;  %p696_p2 = pnand %p695_p0, %p689_p13 }
  0xc8   : > { %v199_v27 = vpop.xlane.xlu0 %198 }
  0xc9   : > { %v205_v29 = vpop.xlane.xlu1 %204  ;;  %v219_v34 = vrot.slane %v199_v27, %v218_v28 }
  0xca   : > { %v231_v37 = vrot.slane %v205_v29, %v230_v31 }
  0xcc   : > { %v202_v33 = vpop.xlane.xlu0 %201 }
  0xcd   : > { %v224_v35 = vrot.slane %v202_v33, %v223_v30  ;;  %v208_v36 = vpop.xlane.xlu1 %207 }
  0xce   : > { %v238_v38 = vrot.slane %v208_v36, %v237_v32 }
  0xcf   : > { %v226_v39 = vsel %vm225_vm4, %v224_v35, %v219_v34 }
  0xd0   : > { %v233_v40 = vsel %vm232_vm5, %v231_v37, %v226_v39 }
  0xd1   : > { %v240_v41 = vsel %vm239_vm6, %v238_v38, %v233_v40 }
  0xd2   : > { %578 = vmatmul.mubr.msk.f32.vlgmr.msra.gmra.mrb[0].mxu0 %vm241_vm0, %v240_v41 }
 0x1a5   : > { %v313_v42 = vpop.f32.mrb[0].mxu0 }
 0x1a6   : > { %v317_v43 = vmax.f32 %v313_v42, 0.0  ;;  %v579_v44 = vpop.f32.mrb[1].mxu0 }
 0x1a8   : > { %589 = vmatmul.mubr.msk.f32.vlgmr.msra.gmra.mrb[0].mxu1 %vm322_vm2, %v317_v43 }
 0x27b   : > { %v404_v45 = vpop.f32.mrb[0].mxu1 }
 0x27c   : > { %v560_v46 = vmul.f32 -1.442695, %v404_v45  ;;  %v590_v47 = vpop.f32.mrb[1].mxu1 }
 0x27e   : > { %652 = vpow2.f32 %v560_v46 }
 0x288   : > { %v653_v48 = vpop.eup %652 }
 0x289   : > { %v411_v49 = vadd.f32 1.0, %v653_v48 }
 0x28b   : > { %654 = vrcp.f32 %v411_v49 }
 0x295   : > { %v655_v51 = vpop.eup %654 }
 0x296   : > { %v425_v52 = vrot.slane %v655_v51, %v424_v50 }
 0x298   : > { %431 = vbcast.lane.b32.xlu1 %v425_v52, 264  ;;  %427 = vbcast.lane.b32.xlu0 %v425_v52, 256 }
 0x29c   : > { %435 = vbcast.lane.b32.xlu1 %v425_v52, 272 }
 0x2a0   : > { %439 = vbcast.lane.b32.xlu1 %v425_v52, 280 }
 0x30a   : > { %v432_v53 = vpop.permute.xlu1 %431  ;;  %v428_v54 = vpop.permute.xlu0 %427 }
 0x30b   : > { %v443_v55 = vmul.f32 %v432_v53, %v907_v5  ;;  %v444_v56 = vmul.f32 %v432_v53, %v909_v6  ;;  %v441_v57 = vmul.f32 %v428_v54, %v897_v0  ;;  %v442_v58 = vmul.f32 %v428_v54, %v899_v1 }
 0x30d   : > { %451 = vst [vmem:[%s188_s27 + $0x10] sm:$0xff] %v443_v55  ;;  %452 = vst [vmem:[%s188_s27 + $0x18] sm:$0xff] %v444_v56 }
 0x30e   : > { %449 = vst [vmem:[%s188_s27] sm:$0xff] %v441_v57  ;;  %450 = vst [vmem:[%s188_s27 + $0x8] sm:$0xff] %v442_v58  ;;  %v436_v59 = vpop.permute.xlu1 %435 }
 0x30f   : > { %v445_v60 = vmul.f32 %v436_v59, %v901_v2  ;;  %v446_v61 = vmul.f32 %v436_v59, %v905_v4 }
 0x311   : > { %453 = vst [vmem:[%s188_s27 + $0x20] sm:$0xff] %v445_v60  ;;  %454 = vst [vmem:[%s188_s27 + $0x28] sm:$0xff] %v446_v61 }
 0x312   : > { %v440_v62 = vpop.permute.xlu1 %439 }
 0x313   : > { %v447_v63 = vmul.f32 %v440_v62, %v913_v8  ;;  %v448_v0 = vmul.f32 %v440_v62, %v915_v9 }
 0x315   : > { %455 = vst [vmem:[%s188_s27 + $0x30] sm:$0xff] %v447_v63  ;;  %456 = vst [vmem:[%s188_s27 + $0x38] sm:$0xff] %v448_v0 }
 0x316   : > { %699 = shalt.err (!%p696_p2)
}
 0x317   : > { %s700_s7 = scalar_lea.hbm %s955_s10, 1024  ;;  %s704_s19 = scalar_lea.hbm %s1004_s3, 2048 }
 0x318   : > { %p701_p4 = scmp.ne.s32.totalorder %s955_s10, %s700_s7  ;;  %p705_p9 = scmp.lt.u32.totalorder %s955_s10, %s1004_s3 }
 0x319   : > { %p706_p1 = scmp.lt.u32.totalorder %s704_s19, %s700_s7  ;;  %p708_p6 = scmp.lt.u32.totalorder %s700_s7, %s955_s10 }
 0x31a   : > { %p702_p5 = pnand %p701_p4, %p1011_p11 }
 0x31b   : > { %p707_p3 = por %p706_p1, %p705_p9 }
 0x31c   : > { %p703_p7 = pneg %p702_p5 }
 0x31d   : > { %p709_p12 = por %p708_p6, %p707_p3 }
 0x31f   : > { %p710_p13 = pnand %p709_p12, %p703_p7 }
 0x321   : > { %713 = shalt.err (!%p710_p13)
}
 0x322   : > { %s761_s26 = smov 256   ;;  %s762_s27 = smov 16  }
 0x323   : > { %601 = dma.vmem_to_hbm [thread:$0]  (%p1011_p11), %s950_s28, 1024, %s955_s10, %s458_s16, %s761_s26, %s761_s26, %s762_s27  }
 0x324 PF: > { %s486_s29 = sand.u32 1, %s740_s12   ;;  %p1012_p8 = scmp.ne.s32.totalorder %s1009_s25, 0 }
 0x325   : > { %p1013_p10 = scmp.ge.s32.totalorder %s752_s15, 2  ;;  %s487_s30 = scalar_lea.sflag [#allocation4], %s486_s29 }
 0x327   : > { %p608_p0 = pnand %p1013_p10, %p1012_p8 }
 0x329   : > { %735 = dma.done.wait (!%p608_p0), %s487_s30, 1024  }
 0x32a   : > { %737 = vsyncadd (!%p608_p0), %s487_s30, 4294966272  ;;  %p16_p2 = scmp.ge.s32.totalorder %s808_s18, 4   ;;  %s1014_s12 = smov %s744_s13 }
 0x32b   : > { %s1015_s13 = smov %s748_s14  ;;  %s1016_s14 = smov %s820_s21 }
 0x32c   : > { %s1017_s15 = smov %s808_s18  ;;  %18 = sbr.rel (!%p16_p2) target bundleno = 5 (0x5), region = 77 }
 0x333   :  { %492 = vsyncpa [#allocation3], 1 }
 0x334   :  { %494 = vsyncpa [#allocation3 + $0x1], 1 }
 0x335   :  { %495 = vsyncpa [#allocation4], 1 }
 0x336   :  { %497 = vsyncpa [#allocation4 + $0x1], 1 }

// kernel: tpu_custom_call.1
= control target key start
LH: loop header
LB: loop body
LE: loop exit
PB: predicated region body
PF: predicated region fallthrough
CT: control target
= control target key end

     0   :  { %8 = vsyncpa [#allocation3], 0  ;;  %s1001_s0 = inlined_call_operand.hbm [shape: f32[2,32,256], index: 0, kind: input, shape index: {}]   ;;  %s1002_s1 = inlined_call_operand.vmem [shape: f32[2,32], index: 1, kind: input, shape index: {}]   ;;  %s1003_s2 = inlined_call_operand.vmem [shape: f32[32,2], index: 2, kind: input, shape index: {}]   ;;  %s1004_s3 = inlined_call_operand.hbm [shape: f32[2,32,256], index: 3, kind: output, shape index: {}]  }
   0x1   :  { %10 = vsyncpa [#allocation3 + $0x1], 0 }
   0x2   :  { %11 = vsyncpa [#allocation4], 0 }
   0x3   :  { %13 = vsyncpa [#allocation4 + $0x1], 0  ;;  %s783_s12 = smov 0   ;;  %s785_s13 = smov 0  }
   0x4   :  { %s787_s14 = smov 0   ;;  %s789_s15 = smov 0  }
   0x5 LB: > { %s804_s16 = sadd.s32 4294967295, %s752_s15   ;;  %s544_s17 = sadd.s32 4294967294, %s752_s15   ;;  %s752_s15 = sphi %s789_s15, %s1017_s15   ;;  %s748_s14 = sphi %s787_s14, %s1016_s14   ;;  %s744_s13 = sphi %s785_s13, %s1015_s13   ;;  %s740_s12 = sphi %s783_s12, %s1014_s12  }
   0x6   : > { %s808_s18 = sadd.s32 1, %s752_s15   ;;  %s26_s19 = sadd.s32 1, %s748_s14 }
   0x7   : > { %s23_s20 = ssub.s32 %s752_s15, %s808_s18  ;;  %p33_p0 = scmp.ne.s32.totalorder %s748_s14, %s744_s13 }
   0x8   : > { %p24_p1 = scmp.eq.s32.totalorder %s23_s20, 0  ;;  %p34_p2 = scmp.eq.s32.totalorder %s752_s15, 0 }
   0x9   : > { %p39_p3 = scmp.ne.s32.totalorder %s744_s13, %s740_s12  ;;  %p40_p4 = scmp.eq.s32.totalorder %s804_s16, 0 }
   0xa   : > { %s820_s21 = scalar_select %p24_p1, %s748_s14, %s26_s19  }
   0xb   : > { %p822_p5 = por %p34_p2, %p33_p0  ;;  %p826_p6 = por %p40_p4, %p39_p3 }
   0xc   : > { %p105_p7 = scmp.eq.s32.totalorder %s804_s16, 1  ;;  %p111_p8 = scmp.eq.s32.totalorder %s544_s17, 1 }
   0xd   : > { %p611_p10 = scmp.lt.s32.totalorder %s752_s15, 2  ;;  %s137_s26 = sand.u32 1, %s748_s14  }
   0xe   : > { %p833_p11 = por %p105_p7, %p33_p0  ;;  %p837_p12 = por %p111_p8, %p39_p3 }
   0xf   : > { %s566_s27 = sshll.u32 %s752_s15, 10  ;;  %s547_s28 = sshll.u32 %s137_s26, 6 }
  0x10   : > { %s1008_s24 = scalar_select %p833_p11, 1, 0 }
  0x11   : > { %s1009_s25 = scalar_select %p837_p12, 1, 0 }
  0x12   : > { %s846_s4 = scalar_lea.hbm %s1001_s0, %s566_s27  ;;  %s141_s5 = scalar_lea.vmem [#allocation2], %s547_s28 }
  0x13   : > { %s148_s6 = sshll.u32 %s141_s5, 4  ;;  %p850_p13 = pnand %p611_p10, %p822_p5  ;;  %s854_s6 = int_to_ptr.vmem [resolvable:$true] %s148_s6 }
  0x14   : > { %s856_s8 = scalar_lea.sflag [#allocation3], %s137_s26  ;;  %s656_s9 = scalar_lea.hbm %s846_s4, 1024 }
  0x15   : > { %p657_p0 = scmp.ne.s32.totalorder %s846_s4, %s656_s9  ;;  %p658_p1 = pneg %p850_p13 }
  0x16   : > { %s661_s17 = scalar_lea.hbm %s1001_s0, 2048  ;;  %p662_p4 = scmp.lt.u32.totalorder %s846_s4, %s1001_s0 }
  0x17   : > { %p659_p2 = pnand %p658_p1, %p657_p0  ;;  %p663_p5 = scmp.lt.u32.totalorder %s661_s17, %s656_s9 }
  0x18   : > { %p665_p8 = scmp.lt.u32.totalorder %s656_s9, %s846_s4 }
  0x19   : > { %p660_p3 = pneg %p659_p2  ;;  %p664_p7 = por %p663_p5, %p662_p4 }
  0x1b   : > { %p666_p10 = por %p665_p8, %p664_p7 }
  0x1d   : > { %p667_p9 = pnand %p666_p10, %p660_p3 }
  0x1f   : > { %670 = shalt.err (!%p667_p9)
}
  0x20   : > { %s671_s22 = scalar_lea.vmem %s854_s6, 1024  ;;  %s754_s26 = smov [#allocation2]  }
  0x21   : > { %p672_p0 = scmp.ne.s32.totalorder %s854_s6, %s671_s22  ;;  %s676_s27 = sshll.u32 %s754_s26, 4  ;;  %s677_s27 = int_to_ptr.vmem [resolvable:$false] %s676_s27 }
  0x22   : > { %s678_s28 = scalar_lea.vmem %s677_s27, 2048  ;;  %p679_p11 = scmp.lt.s32.totalorder %s854_s6, %s677_s27 }
  0x23   : > { %p674_p2 = pnand %p672_p0, %p658_p1  ;;  %p680_p4 = scmp.lt.s32.totalorder %s678_s28, %s671_s22 }
  0x25   : > { %p675_p12 = pneg %p674_p2  ;;  %p681_p5 = por %p680_p4, %p679_p11 }
  0x27   : > { %p682_p7 = pnand %p681_p5, %p675_p12 }
  0x29   : > { %685 = shalt.err (!%p682_p7)
}
  0x2a   : > { %s755_s29 = smov 256   ;;  %s756_s30 = smov 16  }
  0x2b   : > { %606 = dma.hbm_to_vmem [thread:$0]  (!%p850_p13), %s846_s4, 1024, %s854_s6, %s856_s8, %s755_s29, %s755_s29, %s756_s30  }
  0x2c   : > { %p550_p9 = scmp.ge.s32.totalorder %s752_s15, 1  ;;  %p156_p1 = scmp.lt.s32.totalorder %s752_s15, 3 }
  0x2e   : > { %p157_p3 = pnand %p550_p9, %p156_p1 }
  0x2f   : > { %s887_s5 = sand.u32 (!%p157_p3), 1, %s744_s13  }
  0x30   : > { %160 = sbr.rel (%p157_p3) target bundleno = 804 (0x324), region = 32  ;;  %s551_s9 = sshll.u32 (!%p157_p3), %s887_s5, 6 }
  0x31   : > { %s163_s10 = scalar_lea.sflag (!%p157_p3), [#allocation3], %s887_s5  ;;  %s166_s11 = scalar_lea.vmem (!%p157_p3), [#allocation2], %s551_s9 }
  0x37   : > { %731 = dma.done.wait (%p826_p6), %s163_s10, 1024  }
  0x38   : > { %733 = vsyncadd (%p826_p6), %s163_s10, 4294966272  ;;  %v897_v0 = vld [vmem:[%s166_s11] sm:$0xff]  ;;  %v899_v1 = vld [vmem:[%s166_s11 + $0x8] sm:$0xff]  ;;  %v757_v12 = vmov 0.0   ;;  %vm241_vm0 = vcmask 261120   ;;  %vm758_vm1 = vmmov 0   ;;  %v214_v21 = vlaneseq }
  0x39   : > { %v901_v2 = vld [vmem:[%s166_s11 + $0x20] sm:$0xff]  ;;  %v197_v3 = vadd.f32 %v899_v1, %v897_v0  ;;  %v905_v4 = vld [vmem:[%s166_s11 + $0x28] sm:$0xff]  ;;  %v907_v5 = vld [vmem:[%s166_s11 + $0x10] sm:$0xff]  ;;  %575 = vmatprep.subr.mxu0 %v757_v12  ;;  %577 = vmatprep.mubr.msk.f32.mxu0 %vm758_vm1, %v757_v12  ;;  %vm322_vm2 = vcmask 15360   ;;  %v759_v16 = vmov 0.0|0.0   ;;  %vm225_vm4 = vcmask 130112  }
  0x3a   : > { %v909_v6 = vld [vmem:[%s166_s11 + $0x18] sm:$0xff]  ;;  %v203_v7 = vadd.f32 %v905_v4, %v901_v2  ;;  %v913_v8 = vld [vmem:[%s166_s11 + $0x30] sm:$0xff]  ;;  %v209_v13 = vld [vmem:[%s1002_s1] sm:$0x3]  ;;  %588 = vmatprep.mubr.msk.f32.mxu1 %vm758_vm1, %v757_v12  ;;  %591 = vmatprep.subr.bf16.mxu1 %v759_v16  ;;  %v215_v22 = vand.u32 127, %v214_v21  ;;  %v217_v23 = vshrl.u32 %v214_v21, 7 }
  0x3b   : > { %v915_v9 = vld [vmem:[%s166_s11 + $0x38] sm:$0xff]  ;;  %198 = vadd.xlane.f32.xlu0 %v197_v3  ;;  %v200_v10 = vadd.f32 %v909_v6, %v907_v5  ;;  %576 = vmatpush3.xpose.msk.msra.mxu0 %vm241_vm0, %v209_v13  ;;  %v318_v14 = vld [vmem:[%s1003_s2] sm:$0xff]  ;;  %v319_v15 = vld [vmem:[%s1003_s2 + $0x8] sm:$0xff]  ;;  %vm232_vm5 = vcmask 195712   ;;  %vm239_vm6 = vcmask 261312   ;;  %s188_s27 = scalar_lea.vmem [#allocation5], %s551_s9 }
  0x3c   : > { %204 = vadd.xlane.f32.xlu1 %v203_v7  ;;  %v206_v11 = vadd.f32 %v915_v9, %v913_v8  ;;  %v592_v17 = vpack.c.bf16 %v319_v15, %v318_v14  ;;  %vm593_vm3 = vmpackc.low %vm322_vm2, %vm322_vm2  ;;  %v320_v18 = vld [vmem:[%s1003_s2 + $0x10] sm:$0xff]  ;;  %v321_v19 = vld [vmem:[%s1003_s2 + $0x18] sm:$0xff]  ;;  %v220_v24 = vadd.s32 4294967288, %v215_v22  ;;  %v227_v25 = vadd.s32 4294967280, %v215_v22  ;;  %s471_s28 = sshll.u32 %s188_s27, 4  ;;  %s567_s29 = sshll.u32 %s804_s16, 10  ;;  %s950_s28 = int_to_ptr.vmem [resolvable:$true] %s471_s28 }
  0x3d   : > { %v596_v20 = vpack.c.bf16 %v321_v19, %v320_v18  ;;  %v234_v26 = vadd.s32 4294967272, %v215_v22  ;;  %v218_v28 = vsub.s32 %v215_v22, %v217_v23  ;;  %v424_v50 = vsub.s32 0, %v217_v23  ;;  %s955_s10 = scalar_lea.hbm %s1004_s3, %s567_s29  ;;  %s458_s16 = scalar_lea.sflag [#allocation4], %s887_s5 }
  0x3e   : > { %594 = vmatpush3.bf16.xpose.msk.msra.mxu1 %vm593_vm3, %v592_v17  ;;  %v223_v30 = vsub.s32 %v220_v24, %v217_v23  ;;  %v230_v31 = vsub.s32 %v227_v25, %v217_v23  ;;  %s686_s11 = scalar_lea.vmem %s950_s28, 1024  ;;  %p1011_p11 = scmp.ne.s32.totalorder %s1008_s24, 0 }
  0x3f   : > { %201 = vadd.xlane.f32.xlu0 %v200_v10  ;;  %595 = vmatprep.subr.bf16.mxu1 %v759_v16  ;;  %v237_v32 = vsub.s32 %v234_v26, %v217_v23  ;;  %p687_p6 = scmp.ne.s32.totalorder %s950_s28, %s686_s11  ;;  %s760_s23 = smov [#allocation5]  }
  0x40   : > { %207 = vadd.xlane.f32.xlu1 %v206_v11  ;;  %s690_s4 = sshll.u32 %s760_s23, 4  ;;  %s691_s4 = int_to_ptr.vmem [resolvable:$false] %s690_s4 }
  0x41   : > { %p688_p12 = pnand %p687_p6, %p1011_p11  ;;  %s692_s6 = scalar_lea.vmem %s691_s4, 2048 }
  0x42   : > { %p693_p8 = scmp.lt.s32.totalorder %s950_s28, %s691_s4  ;;  %p694_p10 = scmp.lt.s32.totalorder %s692_s6, %s686_s11 }
  0x43   : > { %p689_p13 = pneg %p688_p12 }
  0x44   : > { %p695_p0 = por %p694_p10, %p693_p8 }
  0x46   : > { %598 = vmatpush3.bf16.xpose.msk.msra.mxu1 %vm593_vm3, %v596_v20  ;;  %p696_p2 = pnand %p695_p0, %p689_p13 }
  0xc8   : > { %v199_v27 = vpop.xlane.xlu0 %198 }
  0xc9   : > { %v205_v29 = vpop.xlane.xlu1 %204  ;;  %v219_v34 = vrot.slane %v199_v27, %v218_v28 }
  0xca   : > { %v231_v37 = vrot.slane %v205_v29, %v230_v31 }
  0xcc   : > { %v202_v33 = vpop.xlane.xlu0 %201 }
  0xcd   : > { %v224_v35 = vrot.slane %v202_v33, %v223_v30  ;;  %v208_v36 = vpop.xlane.xlu1 %207 }
  0xce   : > { %v238_v38 = vrot.slane %v208_v36, %v237_v32 }
  0xcf   : > { %v226_v39 = vsel %vm225_vm4, %v224_v35, %v219_v34 }
  0xd0   : > { %v233_v40 = vsel %vm232_vm5, %v231_v37, %v226_v39 }
  0xd1   : > { %v240_v41 = vsel %vm239_vm6, %v238_v38, %v233_v40 }
  0xd2   : > { %578 = vmatmul.mubr.msk.f32.vlgmr.msra.gmra.mrb[0].mxu0 %vm241_vm0, %v240_v41 }
 0x1a5   : > { %v313_v42 = vpop.f32.mrb[0].mxu0 }
 0x1a6   : > { %v317_v43 = vmax.f32 %v313_v42, 0.0  ;;  %v579_v44 = vpop.f32.mrb[1].mxu0 }
 0x1a8   : > { %589 = vmatmul.mubr.msk.f32.vlgmr.msra.gmra.mrb[0].mxu1 %vm322_vm2, %v317_v43 }
 0x27b   : > { %v404_v45 = vpop.f32.mrb[0].mxu1 }
 0x27c   : > { %v560_v46 = vmul.f32 -1.442695, %v404_v45  ;;  %v590_v47 = vpop.f32.mrb[1].mxu1 }
 0x27e   : > { %652 = vpow2.f32 %v560_v46 }
 0x288   : > { %v653_v48 = vpop.eup %652 }
 0x289   : > { %v411_v49 = vadd.f32 1.0, %v653_v48 }
 0x28b   : > { %654 = vrcp.f32 %v411_v49 }
 0x295   : > { %v655_v51 = vpop.eup %654 }
 0x296   : > { %v425_v52 = vrot.slane %v655_v51, %v424_v50 }
 0x298   : > { %431 = vbcast.lane.b32.xlu1 %v425_v52, 264  ;;  %427 = vbcast.lane.b32.xlu0 %v425_v52, 256 }
 0x29c   : > { %435 = vbcast.lane.b32.xlu1 %v425_v52, 272 }
 0x2a0   : > { %439 = vbcast.lane.b32.xlu1 %v425_v52, 280 }
 0x30a   : > { %v432_v53 = vpop.permute.xlu1 %431  ;;  %v428_v54 = vpop.permute.xlu0 %427 }
 0x30b   : > { %v443_v55 = vmul.f32 %v432_v53, %v907_v5  ;;  %v444_v56 = vmul.f32 %v432_v53, %v909_v6  ;;  %v441_v57 = vmul.f32 %v428_v54, %v897_v0  ;;  %v442_v58 = vmul.f32 %v428_v54, %v899_v1 }
 0x30d   : > { %451 = vst [vmem:[%s188_s27 + $0x10] sm:$0xff] %v443_v55  ;;  %452 = vst [vmem:[%s188_s27 + $0x18] sm:$0xff] %v444_v56 }
 0x30e   : > { %449 = vst [vmem:[%s188_s27] sm:$0xff] %v441_v57  ;;  %450 = vst [vmem:[%s188_s27 + $0x8] sm:$0xff] %v442_v58  ;;  %v436_v59 = vpop.permute.xlu1 %435 }
 0x30f   : > { %v445_v60 = vmul.f32 %v436_v59, %v901_v2  ;;  %v446_v61 = vmul.f32 %v436_v59, %v905_v4 }
 0x311   : > { %453 = vst [vmem:[%s188_s27 + $0x20] sm:$0xff] %v445_v60  ;;  %454 = vst [vmem:[%s188_s27 + $0x28] sm:$0xff] %v446_v61 }
 0x312   : > { %v440_v62 = vpop.permute.xlu1 %439 }
 0x313   : > { %v447_v63 = vmul.f32 %v440_v62, %v913_v8  ;;  %v448_v0 = vmul.f32 %v440_v62, %v915_v9 }
 0x315   : > { %455 = vst [vmem:[%s188_s27 + $0x30] sm:$0xff] %v447_v63  ;;  %456 = vst [vmem:[%s188_s27 + $0x38] sm:$0xff] %v448_v0 }
 0x316   : > { %699 = shalt.err (!%p696_p2)
}
 0x317   : > { %s700_s7 = scalar_lea.hbm %s955_s10, 1024  ;;  %s704_s19 = scalar_lea.hbm %s1004_s3, 2048 }
 0x318   : > { %p701_p4 = scmp.ne.s32.totalorder %s955_s10, %s700_s7  ;;  %p705_p9 = scmp.lt.u32.totalorder %s955_s10, %s1004_s3 }
 0x319   : > { %p706_p1 = scmp.lt.u32.totalorder %s704_s19, %s700_s7  ;;  %p708_p6 = scmp.lt.u32.totalorder %s700_s7, %s955_s10 }
 0x31a   : > { %p702_p5 = pnand %p701_p4, %p1011_p11 }
 0x31b   : > { %p707_p3 = por %p706_p1, %p705_p9 }
 0x31c   : > { %p703_p7 = pneg %p702_p5 }
 0x31d   : > { %p709_p12 = por %p708_p6, %p707_p3 }
 0x31f   : > { %p710_p13 = pnand %p709_p12, %p703_p7 }
 0x321   : > { %713 = shalt.err (!%p710_p13)
}
 0x322   : > { %s761_s26 = smov 256   ;;  %s762_s27 = smov 16  }
 0x323   : > { %601 = dma.vmem_to_hbm [thread:$0]  (%p1011_p11), %s950_s28, 1024, %s955_s10, %s458_s16, %s761_s26, %s761_s26, %s762_s27  }
 0x324 PF: > { %s486_s29 = sand.u32 1, %s740_s12   ;;  %p1012_p8 = scmp.ne.s32.totalorder %s1009_s25, 0 }
 0x325   : > { %p1013_p10 = scmp.ge.s32.totalorder %s752_s15, 2  ;;  %s487_s30 = scalar_lea.sflag [#allocation4], %s486_s29 }
 0x327   : > { %p608_p0 = pnand %p1013_p10, %p1012_p8 }
 0x329   : > { %735 = dma.done.wait (!%p608_p0), %s487_s30, 1024  }
 0x32a   : > { %737 = vsyncadd (!%p608_p0), %s487_s30, 4294966272  ;;  %p16_p2 = scmp.ge.s32.totalorder %s808_s18, 4   ;;  %s1014_s12 = smov %s744_s13 }
 0x32b   : > { %s1015_s13 = smov %s748_s14  ;;  %s1016_s14 = smov %s820_s21 }
 0x32c   : > { %s1017_s15 = smov %s808_s18  ;;  %18 = sbr.rel (!%p16_p2) target bundleno = 5 (0x5), region = 77 }
 0x333   :  { %492 = vsyncpa [#allocation3], 1 }
 0x334   :  { %494 = vsyncpa [#allocation3 + $0x1], 1 }
 0x335   :  { %495 = vsyncpa [#allocation4], 1 }
 0x336   :  { %497 = vsyncpa [#allocation4 + $0x1], 1 }

</bundles_post_ra>
